<compile_context>
chip_gen: v7x
topology: tpu7x:2x2x1
jax: 0.10.0
libtpu: 0.0.40
codegen_flags: <defaults>
</compile_context>

<pallas_src>
import numpy as np
import jax
import jax.numpy as jnp
from jax.experimental import pallas as pl
from jax.experimental.pallas import tpu as pltpu

LANE = 128                             # lane width: output padding granularity
SRC_BLK = 128                          # source column block streamed HBM->VMEM
VMEM_BLOCK_BUDGET = 4 * 1024 * 1024    # per-call block budget (v7x-safe)


# ---------------------------------------------------------------------------
# Parameter setup (replaces np.load(coordinates.npy) + observability_idx):
# deterministic, in-script synthesis of the observable-cell index set.
# ---------------------------------------------------------------------------
def observability_idx(coordinates, min_x, min_y, max_x, max_y, nx, ny, radius):
    # Synthetic stand-in for the original helper: a grid cell is "observable"
    # if any sensor coordinate lies within `radius` of the cell center.
    xs = np.linspace(min_x, max_x, nx)
    ys = np.linspace(min_y, max_y, ny)
    gx, gy = np.meshgrid(xs, ys, indexing="ij")
    centers = np.stack([gx.ravel(), gy.ravel()], axis=-1)          # [nx*ny, 2]
    d2 = np.sum((centers[:, None, :] - coordinates[None, :, :]) ** 2, axis=-1)
    observable = np.any(d2 <= radius ** 2, axis=-1)
    return np.nonzero(observable)[0].astype(np.int32)              # sorted, may be empty


def _index_runs(idx):
    """Group a sorted 1-D index array into (src_start, dst_start, length) runs."""
    runs = []
    start = 0
    n = len(idx)
    while start < n:
        end = start + 1
        while end < n and idx[end] == idx[end - 1] + 1:
            end += 1
        runs.append((int(idx[start]), int(start), int(end - start)))
        start = end
    return tuple(runs)


def _build_schedule(obs_idx, blk):
    """Split runs at `blk`-wide source-block boundaries and group them by the
    source block they read from.

    Returns:
      src_block_ids: int32[num_src_blocks], sorted distinct source block ids
                     (only blocks that contain >=1 observed column).
      schedules:     tuple (per selected block, same order) of
                     (src_offset_within_block, dst_abs, length) runs.
    """
    by_block = {}
    for src, dst, length in _index_runs(obs_idx):
        while length > 0:
            b = src // blk
            take = min(length, (b + 1) * blk - src)
            by_block.setdefault(b, []).append((src - b * blk, dst, take))
            src += take
            dst += take
            length -= take
    block_ids = sorted(by_block)
    schedules = tuple(tuple(by_block[b]) for b in block_ids)
    return np.asarray(block_ids, dtype=np.int32), schedules


# ---------------------------------------------------------------------------
# Pallas kernel: streamed source blocks, static per-block run copies.
# ---------------------------------------------------------------------------
def _make_kernel(block_schedules):
    """Kernel body with the static per-source-block copy schedule baked in."""

    def kernel(src_blocks_ref, x_ref, o_ref):
        # src_blocks_ref: SMEM scalar-prefetch array (used only by index_maps).
        # x_ref: (TB, SRC_BLK) current source column block (auto double-buffered).
        # o_ref: (TB, n_pad) output block, resident across the source-block axis.
        del src_blocks_ref
        for k_static, runs in enumerate(block_schedules):
            @pl.when(pl.program_id(1) == k_static)
            def _copy(runs=runs):
                # Direct ref->ref run copies: only the needed lane columns are
                # loaded/stored — no full-tile load, no full-output zero fill.
                for src_local, dst, length in runs:
                    o_ref[:, dst:dst + length] = x_ref[:, src_local:src_local + length]

    return kernel


def _pick_batch_tile(b_pad, sub, n_pad, itemsize):
    """Largest batch tile that divides b_pad, keeps >=2 batch tiles when
    possible (v7x megacore), and fits the VMEM block budget (double-buffered
    input block + resident output block)."""
    target = b_pad if b_pad < 2 * sub else b_pad // 2
    tb = sub
    t = sub
    while t <= target:
        if b_pad % t == 0 and 2 * t * (SRC_BLK + n_pad) * itemsize <= VMEM_BLOCK_BUDGET:
            tb = t
        t += sub
    return tb


def observation_model_forward(white_box_output, src_block_ids, block_schedules, n_obs):
    """Equivalent of ObservationModel.forward: white_box_output[:, obs_idx]."""
    B, N = white_box_output.shape
    dtype = white_box_output.dtype
    if n_obs == 0:                       # faithful empty-observation case: [B, 0]
        return jnp.zeros((B, 0), dtype=dtype)

    itemsize = jnp.dtype(dtype).itemsize
    sub = 8 if itemsize >= 4 else 16                     # sublane multiple per dtype
    b_pad = ((B + sub - 1) // sub) * sub
    n_pad = ((n_obs + LANE - 1) // LANE) * LANE          # lane-dense output width

    x = white_box_output
    if b_pad != B:                                       # pad batch to sublane multiple
        x = jnp.pad(x, ((0, b_pad - B), (0, 0)))

    num_src_blocks = len(block_schedules)
    tb = _pick_batch_tile(b_pad, sub, n_pad, itemsize)

    out_pad = pl.pallas_call(
        _make_kernel(block_schedules),
        out_shape=jax.ShapeDtypeStruct((b_pad, n_pad), dtype),
        grid_spec=pltpu.PrefetchScalarGridSpec(
            num_scalar_prefetch=1,
            grid=(b_pad // tb, num_src_blocks),
            # Only source column blocks containing >=1 observed cell are DMA'd
            # (block id comes from the SMEM prefetch array).
            in_specs=[pl.BlockSpec((tb, SRC_BLK), lambda i, k, sb: (i, sb[k]))],
            # Output block stays resident across the source-block axis and is
            # written back to HBM once per batch tile.
            out_specs=pl.BlockSpec((tb, n_pad), lambda i, k, sb: (i, 0)),
        ),
        compiler_params=pltpu.CompilerParams(
            dimension_semantics=("parallel", "arbitrary"),
            vmem_limit_bytes=32 * 1024 * 1024),
    )(src_block_ids, x)

    if b_pad == B and n_pad == n_obs:    # exact-width path: no extra slice op
        return out_pad
    return out_pad[:B, :n_obs]


# ---------------------------------------------------------------------------
# ObservationModel analogue
# ---------------------------------------------------------------------------
class ObservationModel:
    def __init__(self, nx, ny, coordinates):
        min_x, min_y = np.min(coordinates, axis=0)
        max_x, max_y = np.max(coordinates, axis=0)
        obs_idx = observability_idx(coordinates, min_x, min_y, max_x, max_y,
                                    nx, ny, 0.1)
        self.obs_idx = jnp.asarray(obs_idx)              # exposed like the torch attr
        self._n_obs = int(obs_idx.shape[0])
        # Static index set -> static DMA + copy schedule, baked at __init__.
        block_ids_np, self._block_schedules = _build_schedule(obs_idx, SRC_BLK)
        self._src_block_ids = jnp.asarray(block_ids_np, dtype=jnp.int32)

    def __call__(self, white_box_output):
        return observation_model_forward(white_box_output, self._src_block_ids,
                                         self._block_schedules, self._n_obs)


if __name__ == "__main__":
    nx, ny = 16, 16          # spatial grid -> feature dim N = 256 (2 source blocks)
    batch = 10               # exercises sublane padding (10 -> 16) and 2 batch tiles
    n_coords = 12            # sparse sensors -> a non-trivial observable subset

    key = jax.random.PRNGKey(0)
    k_coord, k_x = jax.random.split(key)

    # deterministic synthetic "sensor coordinates" in [0, 1]^2
    coordinates = np.asarray(
        jax.random.uniform(k_coord, (n_coords, 2), dtype=jnp.float32))

    model = ObservationModel(nx, ny, coordinates)

    # white-box model output: [batch, nx*ny]
    white_box_output = jax.random.normal(
        k_x, (batch, nx * ny), dtype=jnp.float32)

    out = model(white_box_output)
    out = jax.block_until_ready(out)

    # reference check against plain JAX indexing (== torch x[:, obs_idx]); exact.
    ref = white_box_output[:, model.obs_idx]
    assert out.shape == (batch, int(model.obs_idx.shape[0])), out.shape
    np.testing.assert_allclose(np.asarray(out), np.asarray(ref), rtol=0, atol=0)

    print("KERNEL_OK")
</pallas_src>

<mosaic_0001>
module attributes {stable_mosaic.version = 11 : i64} {
  func.func @kernel(%arg0: i32, %arg1: i32, %arg2: memref<2xi32, #tpu.memory_space<smem>>, %arg3: memref<8x128xf32, #tpu.memory_space<vmem>>, %arg4: memref<8x128xf32, #tpu.memory_space<vmem>>) attributes {dimension_semantics = [#tpu.dimension_semantics<parallel>, #tpu.dimension_semantics<arbitrary>], iteration_bounds = array<i64: 2, 2>, scalar_prefetch = 1 : i64, scratch_operands = 0 : i64, tpu.core_type = #tpu.core_type<tc>, window_params = [{transform_indices = @transform_0, window_bounds = array<i64: 8, 128>}, {transform_indices = @transform_1, window_bounds = array<i64: 8, 128>}]} {
    %c0_i32 = arith.constant 0 : i32
    %0 = arith.cmpi eq, %arg1, %c0_i32 : i32
    %1 = arith.extui %0 : i1 to i32
    %c0_i32_0 = arith.constant 0 : i32
    %2 = arith.cmpi ne, %1, %c0_i32_0 : i32
    scf.if %2 {
      %c0 = arith.constant 0 : index
      %c8 = arith.constant 8 : index
      %6 = vector.load %arg3[%c0, %c8] : memref<8x128xf32, #tpu.memory_space<vmem>>, vector<8x6xf32>
      %c0_2 = arith.constant 0 : index
      %c0_3 = arith.constant 0 : index
      %7 = vector.load %arg4[%c0_2, %c0_3] : memref<8x128xf32, #tpu.memory_space<vmem>>, vector<8x6xf32>
      tpu.vector_store %arg4[%c0_2, %c0_3], %6 {strides = array<i32>} : memref<8x128xf32, #tpu.memory_space<vmem>>, vector<8x6xf32>,
      %c0_4 = arith.constant 0 : index
      %c17 = arith.constant 17 : index
      %8 = vector.load %arg3[%c0_4, %c17] : memref<8x128xf32, #tpu.memory_space<vmem>>, vector<8x2xf32>
      %c0_5 = arith.constant 0 : index
      %c6 = arith.constant 6 : index
      %9 = vector.load %arg4[%c0_5, %c6] : memref<8x128xf32, #tpu.memory_space<vmem>>, vector<8x2xf32>
      tpu.vector_store %arg4[%c0_5, %c6], %8 {strides = array<i32>} : memref<8x128xf32, #tpu.memory_space<vmem>>, vector<8x2xf32>,
      %c0_6 = arith.constant 0 : index
      %c25 = arith.constant 25 : index
      %10 = vector.load %arg3[%c0_6, %c25] : memref<8x128xf32, #tpu.memory_space<vmem>>, vector<8x6xf32>
      %c0_7 = arith.constant 0 : index
      %c8_8 = arith.constant 8 : index
      %11 = vector.load %arg4[%c0_7, %c8_8] : memref<8x128xf32, #tpu.memory_space<vmem>>, vector<8x6xf32>
      tpu.vector_store %arg4[%c0_7, %c8_8], %10 {strides = array<i32>} : memref<8x128xf32, #tpu.memory_space<vmem>>, vector<8x6xf32>,
      %c0_9 = arith.constant 0 : index
      %c32 = arith.constant 32 : index
      %12 = vector.load %arg3[%c0_9, %c32] : memref<8x128xf32, #tpu.memory_space<vmem>>, vector<8x5xf32>
      %c0_10 = arith.constant 0 : index
      %c14 = arith.constant 14 : index
      %13 = vector.load %arg4[%c0_10, %c14] : memref<8x128xf32, #tpu.memory_space<vmem>>, vector<8x5xf32>
      tpu.vector_store %arg4[%c0_10, %c14], %12 {strides = array<i32>} : memref<8x128xf32, #tpu.memory_space<vmem>>, vector<8x5xf32>,
      %c0_11 = arith.constant 0 : index
      %c42 = arith.constant 42 : index
      %14 = vector.load %arg3[%c0_11, %c42] : memref<8x128xf32, #tpu.memory_space<vmem>>, vector<8x5xf32>
      %c0_12 = arith.constant 0 : index
      %c19 = arith.constant 19 : index
      %15 = vector.load %arg4[%c0_12, %c19] : memref<8x128xf32, #tpu.memory_space<vmem>>, vector<8x5xf32>
      tpu.vector_store %arg4[%c0_12, %c19], %14 {strides = array<i32>} : memref<8x128xf32, #tpu.memory_space<vmem>>, vector<8x5xf32>,
      %c0_13 = arith.constant 0 : index
      %c49 = arith.constant 49 : index
      %16 = vector.load %arg3[%c0_13, %c49] : memref<8x128xf32, #tpu.memory_space<vmem>>, vector<8x4xf32>
      %c0_14 = arith.constant 0 : index
      %c24 = arith.constant 24 : index
      %17 = vector.load %arg4[%c0_14, %c24] : memref<8x128xf32, #tpu.memory_space<vmem>>, vector<8x4xf32>
      tpu.vector_store %arg4[%c0_14, %c24], %16 {strides = array<i32>} : memref<8x128xf32, #tpu.memory_space<vmem>>, vector<8x4xf32>,
      %c0_15 = arith.constant 0 : index
      %c60 = arith.constant 60 : index
      %18 = vector.load %arg3[%c0_15, %c60] : memref<8x128xf32, #tpu.memory_space<vmem>>, vector<8x2xf32>
      %c0_16 = arith.constant 0 : index
      %c28 = arith.constant 28 : index
      %19 = vector.load %arg4[%c0_16, %c28] : memref<8x128xf32, #tpu.memory_space<vmem>>, vector<8x2xf32>
      tpu.vector_store %arg4[%c0_16, %c28], %18 {strides = array<i32>} : memref<8x128xf32, #tpu.memory_space<vmem>>, vector<8x2xf32>,
      %c0_17 = arith.constant 0 : index
      %c66 = arith.constant 66 : index
      %20 = vector.load %arg3[%c0_17, %c66] : memref<8x128xf32, #tpu.memory_space<vmem>>, vector<8x3xf32>
      %c0_18 = arith.constant 0 : index
      %c30 = arith.constant 30 : index
      %21 = vector.load %arg4[%c0_18, %c30] : memref<8x128xf32, #tpu.memory_space<vmem>>, vector<8x3xf32>
      tpu.vector_store %arg4[%c0_18, %c30], %20 {strides = array<i32>} : memref<8x128xf32, #tpu.memory_space<vmem>>, vector<8x3xf32>,
    } else {
    }
    %c1_i32 = arith.constant 1 : i32
    %3 = arith.cmpi eq, %arg1, %c1_i32 : i32
    %4 = arith.extui %3 : i1 to i32
    %c0_i32_1 = arith.constant 0 : i32
    %5 = arith.cmpi ne, %4, %c0_i32_1 : i32
    scf.if %5 {
      %c0 = arith.constant 0 : index
      %c34 = arith.constant 34 : index
      %6 = vector.load %arg3[%c0, %c34] : memref<8x128xf32, #tpu.memory_space<vmem>>, vector<8x1xf32>
      %c0_2 = arith.constant 0 : index
      %c33 = arith.constant 33 : index
      %7 = vector.load %arg4[%c0_2, %c33] : memref<8x128xf32, #tpu.memory_space<vmem>>, vector<8x1xf32>
      tpu.vector_store %arg4[%c0_2, %c33], %6 {strides = array<i32>} : memref<8x128xf32, #tpu.memory_space<vmem>>, vector<8x1xf32>,
      %c0_3 = arith.constant 0 : index
      %c36 = arith.constant 36 : index
      %8 = vector.load %arg3[%c0_3, %c36] : memref<8x128xf32, #tpu.memory_space<vmem>>, vector<8x3xf32>
      %c0_4 = arith.constant 0 : index
      %c34_5 = arith.constant 34 : index
      %9 = vector.load %arg4[%c0_4, %c34_5] : memref<8x128xf32, #tpu.memory_space<vmem>>, vector<8x3xf32>
      tpu.vector_store %arg4[%c0_4, %c34_5], %8 {strides = array<i32>} : memref<8x128xf32, #tpu.memory_space<vmem>>, vector<8x3xf32>,
      %c0_6 = arith.constant 0 : index
      %c49 = arith.constant 49 : index
      %10 = vector.load %arg3[%c0_6, %c49] : memref<8x128xf32, #tpu.memory_space<vmem>>, vector<8x7xf32>
      %c0_7 = arith.constant 0 : index
      %c37 = arith.constant 37 : index
      %11 = vector.load %arg4[%c0_7, %c37] : memref<8x128xf32, #tpu.memory_space<vmem>>, vector<8x7xf32>
      tpu.vector_store %arg4[%c0_7, %c37], %10 {strides = array<i32>} : memref<8x128xf32, #tpu.memory_space<vmem>>, vector<8x7xf32>,
      %c0_8 = arith.constant 0 : index
      %c59 = arith.constant 59 : index
      %12 = vector.load %arg3[%c0_8, %c59] : memref<8x128xf32, #tpu.memory_space<vmem>>, vector<8x1xf32>
      %c0_9 = arith.constant 0 : index
      %c44 = arith.constant 44 : index
      %13 = vector.load %arg4[%c0_9, %c44] : memref<8x128xf32, #tpu.memory_space<vmem>>, vector<8x1xf32>
      tpu.vector_store %arg4[%c0_9, %c44], %12 {strides = array<i32>} : memref<8x128xf32, #tpu.memory_space<vmem>>, vector<8x1xf32>,
      %c0_10 = arith.constant 0 : index
      %c62 = arith.constant 62 : index
      %14 = vector.load %arg3[%c0_10, %c62] : memref<8x128xf32, #tpu.memory_space<vmem>>, vector<8x2xf32>
      %c0_11 = arith.constant 0 : index
      %c45 = arith.constant 45 : index
      %15 = vector.load %arg4[%c0_11, %c45] : memref<8x128xf32, #tpu.memory_space<vmem>>, vector<8x2xf32>
      tpu.vector_store %arg4[%c0_11, %c45], %14 {strides = array<i32>} : memref<8x128xf32, #tpu.memory_space<vmem>>, vector<8x2xf32>,
      %c0_12 = arith.constant 0 : index
      %c65 = arith.constant 65 : index
      %16 = vector.load %arg3[%c0_12, %c65] : memref<8x128xf32, #tpu.memory_space<vmem>>, vector<8x6xf32>
      %c0_13 = arith.constant 0 : index
      %c47 = arith.constant 47 : index
      %17 = vector.load %arg4[%c0_13, %c47] : memref<8x128xf32, #tpu.memory_space<vmem>>, vector<8x6xf32>
      tpu.vector_store %arg4[%c0_13, %c47], %16 {strides = array<i32>} : memref<8x128xf32, #tpu.memory_space<vmem>>, vector<8x6xf32>,
      %c0_14 = arith.constant 0 : index
      %c74 = arith.constant 74 : index
      %18 = vector.load %arg3[%c0_14, %c74] : memref<8x128xf32, #tpu.memory_space<vmem>>, vector<8x3xf32>
      %c0_15 = arith.constant 0 : index
      %c53 = arith.constant 53 : index
      %19 = vector.load %arg4[%c0_15, %c53] : memref<8x128xf32, #tpu.memory_space<vmem>>, vector<8x3xf32>
      tpu.vector_store %arg4[%c0_15, %c53], %18 {strides = array<i32>} : memref<8x128xf32, #tpu.memory_space<vmem>>, vector<8x3xf32>,
      %c0_16 = arith.constant 0 : index
      %c78 = arith.constant 78 : index
      %20 = vector.load %arg3[%c0_16, %c78] : memref<8x128xf32, #tpu.memory_space<vmem>>, vector<8x2xf32>
      %c0_17 = arith.constant 0 : index
      %c56 = arith.constant 56 : index
      %21 = vector.load %arg4[%c0_17, %c56] : memref<8x128xf32, #tpu.memory_space<vmem>>, vector<8x2xf32>
      tpu.vector_store %arg4[%c0_17, %c56], %20 {strides = array<i32>} : memref<8x128xf32, #tpu.memory_space<vmem>>, vector<8x2xf32>,
      %c0_18 = arith.constant 0 : index
      %c81 = arith.constant 81 : index
      %22 = vector.load %arg3[%c0_18, %c81] : memref<8x128xf32, #tpu.memory_space<vmem>>, vector<8x4xf32>
      %c0_19 = arith.constant 0 : index
      %c58 = arith.constant 58 : index
      %23 = vector.load %arg4[%c0_19, %c58] : memref<8x128xf32, #tpu.memory_space<vmem>>, vector<8x4xf32>
      tpu.vector_store %arg4[%c0_19, %c58], %22 {strides = array<i32>} : memref<8x128xf32, #tpu.memory_space<vmem>>, vector<8x4xf32>,
      %c0_20 = arith.constant 0 : index
      %c90 = arith.constant 90 : index
      %24 = vector.load %arg3[%c0_20, %c90] : memref<8x128xf32, #tpu.memory_space<vmem>>, vector<8x3xf32>
      %c0_21 = arith.constant 0 : index
      %c62_22 = arith.constant 62 : index
      %25 = vector.load %arg4[%c0_21, %c62_22] : memref<8x128xf32, #tpu.memory_space<vmem>>, vector<8x3xf32>
      tpu.vector_store %arg4[%c0_21, %c62_22], %24 {strides = array<i32>} : memref<8x128xf32, #tpu.memory_space<vmem>>, vector<8x3xf32>,
      %c0_23 = arith.constant 0 : index
      %c94 = arith.constant 94 : index
      %26 = vector.load %arg3[%c0_23, %c94] : memref<8x128xf32, #tpu.memory_space<vmem>>, vector<8x7xf32>
      %c0_24 = arith.constant 0 : index
      %c65_25 = arith.constant 65 : index
      %27 = vector.load %arg4[%c0_24, %c65_25] : memref<8x128xf32, #tpu.memory_space<vmem>>, vector<8x7xf32>
      tpu.vector_store %arg4[%c0_24, %c65_25], %26 {strides = array<i32>} : memref<8x128xf32, #tpu.memory_space<vmem>>, vector<8x7xf32>,
      %c0_26 = arith.constant 0 : index
      %c107 = arith.constant 107 : index
      %28 = vector.load %arg3[%c0_26, %c107] : memref<8x128xf32, #tpu.memory_space<vmem>>, vector<8x3xf32>
      %c0_27 = arith.constant 0 : index
      %c72 = arith.constant 72 : index
      %29 = vector.load %arg4[%c0_27, %c72] : memref<8x128xf32, #tpu.memory_space<vmem>>, vector<8x3xf32>
      tpu.vector_store %arg4[%c0_27, %c72], %28 {strides = array<i32>} : memref<8x128xf32, #tpu.memory_space<vmem>>, vector<8x3xf32>,
      %c0_28 = arith.constant 0 : index
      %c112 = arith.constant 112 : index
      %30 = vector.load %arg3[%c0_28, %c112] : memref<8x128xf32, #tpu.memory_space<vmem>>, vector<8x2xf32>
      %c0_29 = arith.constant 0 : index
      %c75 = arith.constant 75 : index
      %31 = vector.load %arg4[%c0_29, %c75] : memref<8x128xf32, #tpu.memory_space<vmem>>, vector<8x2xf32>
      tpu.vector_store %arg4[%c0_29, %c75], %30 {strides = array<i32>} : memref<8x128xf32, #tpu.memory_space<vmem>>, vector<8x2xf32>,
      %c0_30 = arith.constant 0 : index
      %c123 = arith.constant 123 : index
      %32 = vector.load %arg3[%c0_30, %c123] : memref<8x128xf32, #tpu.memory_space<vmem>>, vector<8x3xf32>
      %c0_31 = arith.constant 0 : index
      %c77 = arith.constant 77 : index
      %33 = vector.load %arg4[%c0_31, %c77] : memref<8x128xf32, #tpu.memory_space<vmem>>, vector<8x3xf32>
      tpu.vector_store %arg4[%c0_31, %c77], %32 {strides = array<i32>} : memref<8x128xf32, #tpu.memory_space<vmem>>, vector<8x3xf32>,
    } else {
    }
    return
  }
  func.func @transform_0(%arg0: i32, %arg1: i32, %arg2: memref<2xi32, #tpu.memory_space<smem>>) -> (i32, i32) {
    %0 = arith.index_cast %arg1 : i32 to index
    %1 = memref.load %arg2[%0] : memref<2xi32, #tpu.memory_space<smem>>
    %c0_i32 = arith.constant 0 : i32
    return %arg0, %1 : i32, i32
  }
  func.func @transform_1(%arg0: i32, %arg1: i32, %arg2: memref<2xi32, #tpu.memory_space<smem>>) -> (i32, i32) {
    %c0_i32 = arith.constant 0 : i32
    %c0_i32_0 = arith.constant 0 : i32
    return %arg0, %c0_i32 : i32, i32
  }
}

</mosaic_0001>

<bundles_post_ra>
// kernel: tpu_custom_call.1
= control target key start
LH: loop header
LB: loop body
LE: loop exit
PB: predicated region body
PF: predicated region fallthrough
CT: control target
= control target key end

     0   :  { %s1030_s0 = inlined_call_operand.hbm [shape: s32[2], index: 0, kind: input, shape index: {}]   ;;  %s1031_s1 = inlined_call_operand.hbm [shape: f32[16,256], index: 1, kind: input, shape index: {}]   ;;  %s1032_s2 = inlined_call_operand.hbm [shape: f32[16,128], index: 2, kind: output, shape index: {}]  }
   0x1   :  { %s561_s11 = scalar_lea.hbm %s1030_s0, 16 }
   0x2   :  { %p562_p0 = scmp.ne.s32.totalorder %s1030_s0, %s561_s11  ;;  %p565_p1 = scmp.lt.u32.totalorder %s561_s11, %s1030_s0 }
   0x4   :  { %p567_p2 = pnand %p565_p1, %p562_p0 }
   0x6   :  { %570 = shalt.err (!%p567_p2)  }
   0x7   :  { %s727_s16 = smov [#allocation3]  }
   0x8   :  { %8 = dma.hbm_to_smem %s1030_s0, 16, %s727_s16, [#allocation2] }
   0x9   :  { %673 = dma.done.wait [#allocation2], 16 }
   0xa   :  { %674 = vsyncadd [#allocation2], 4294967280 }
   0xb   :  { %10 = sfence }
   0xc   :  { %11 = vsyncpa [#allocation5], 0 }
   0xd   :  { %13 = vsyncpa [#allocation5 + $0x1], 0 }
   0xe   :  { %14 = vsyncpa [#allocation6], 0 }
   0xf   :  { %16 = vsyncpa [#allocation6 + $0x1], 0  ;;  %s779_s19 = smov 0   ;;  %s781_s20 = smov 0  }
  0x10   :  { %s783_s21 = smov 0   ;;  %s785_s22 = smov 0  }
  0x11   :  { %s787_s23 = smov 0   ;;  %s789_s24 = smov 0  }
  0x12   :  { %s791_s0 = smov 0   ;;  %s793_s25 = smov 0  }
  0x13   :  { %s795_s26 = smov 0   ;;  %s797_s27 = smov 0  }
  0x14   :  { %s799_s28 = smov 0  }
  0x15 LB: > { %1038 = sst [smem:[#allocation13_spill]] %s717_s26  ;;  %s416_s29 = sadd.s32 4294967295, %s725_s28   ;;  %s725_s28 = sphi %s799_s28, %s22_s28   ;;  %s721_s27 = sphi %s797_s27, %s1059_s27   ;;  %s717_s26 = sphi %s795_s26, %s1050_s26   ;;  %s713_s25 = sphi %s793_s25, %s1058_s25   ;;  %s709_s0 = sphi %s791_s0, %s1049_s0   ;;  %s705_s24 = sphi %s789_s24, %s1057_s24   ;;  %s701_s23 = sphi %s787_s23, %s1056_s23   ;;  %s697_s22 = sphi %s785_s22, %s1055_s22   ;;  %s693_s21 = sphi %s783_s21, %s1054_s21   ;;  %s689_s20 = sphi %s781_s20, %s1053_s20   ;;  %s685_s19 = sphi %s779_s19, %s1052_s19  }
  0x16   : > { %s417_s30 = sadd.s32 4294967294, %s725_s28   ;;  %s31_s3 = sadd.s32 1, %s717_s26 }
  0x17   : > { %p32_p3 = scmp.ge.s32.totalorder %s31_s3, 2  ;;  %s34_s4 = sadd.s32 1, %s721_s27 }
  0x18   : > { %s38_s5 = sld [smem:[#allocation3 + %s717_s26]]  ;;  %s45_s6 = sadd.s32 1, %s705_s24 }
  0x19   : > { %s1061_s3 = smov (%p32_p3, %s31_s3), 0  ;;  %s1063_s4 = smov (!%p32_p3, %s34_s4), %s721_s27 }
  0x1a   : > { %1039 = sst [smem:[#allocation14_spill]] %s1061_s3  ;;  %p52_p4 = scmp.ne.s32.totalorder %s705_s24, %s701_s23 }
  0x1b   : > { %s39_s7 = sld [smem:[#allocation3 + %s1061_s3]]  ;;  %p36_p5 = scmp.ge.s32.totalorder %s1063_s4, 2 }
  0x1c   : > { %p58_p6 = scmp.ne.s32.totalorder %s701_s23, %s697_s22  ;;  %p53_p7 = scmp.eq.s32.totalorder %s725_s28, 0 }
  0x1d   : > { %p59_p8 = scmp.eq.s32.totalorder %s416_s29, 0  ;;  %s1065_s4 = smov (%p36_p5, %s1063_s4), 0 }
  0x1e   : > { %1040 = sst [smem:[#allocation15_spill]] %s1065_s4  ;;  %s71_s9 = sadd.s32 1, %s693_s21 }
  0x1f   : > { %p848_p9 = por %p59_p8, %p58_p6  ;;  %s40_s10 = ssub.s32 %s721_s27, %s1065_s4 }
  0x20   : > { %p81_p10 = scmp.ne.s32.totalorder %s693_s21, %s689_s20  ;;  %p69_p11 = scmp.eq.s32.totalorder %s40_s10, 0 }
  0x21   : > { %s1041_s8 = scalar_select %p848_p9, 1, 0 }
  0x22   : > { %s41_s11 = ssub.s32 %s38_s5, %s39_s7  ;;  %p82_p12 = scmp.eq.s32.totalorder %s416_s29, 3 }
  0x23   : > { %s42_s12 = sor.u32 %s41_s11, %s40_s10  ;;  %p87_p0 = scmp.ne.s32.totalorder %s689_s20, %s685_s19 }
  0x24   : > { %p43_p13 = scmp.eq.s32.totalorder %s42_s12, 0  ;;  %p865_p1 = por %p82_p12, %p81_p10 }
  0x25   : > { %s860_s13 = scalar_select %p69_p11, %s693_s21, %s71_s9  }
  0x26   : > { %s863_s14 = scalar_select %p43_p13, %s705_s24, %s45_s6  }
  0x27   : > { %s1042_s15 = scalar_select %p865_p1, 1, 0 }
  0x28   : > { %p88_p2 = scmp.eq.s32.totalorder %s417_s30, 3  ;;  %p54_p3 = por %p53_p7, %p52_p4 }
  0x29   : > { %s108_s17 = sand.u32 1, %s705_s24   ;;  %p448_p6 = scmp.lt.s32.totalorder %s725_s28, 4 }
  0x2a   : > { %p874_p5 = por %p88_p2, %p87_p0  ;;  %s420_s18 = sshll.u32 %s108_s17, 3 }
  0x2b   : > { %s432_s22 = scalar_select %p54_p3, [#allocation3], [#allocation8] }
  0x2c   : > { %s1043_s16 = scalar_select %p874_p5, 1, 0 }
  0x2d   : > { %s433_s29 = scalar_select %p54_p3, %s717_s26, 0 }
  0x2e   : > { %s1067_s22 = smov (!%p448_p6, %s432_s22), [#allocation9]  ;;  %p881_p8 = pnand %p448_p6, %p54_p3 }
  0x2f   : > { %s1069_s29 = smov (!%p448_p6, %s433_s29), 0  ;;  %p423_p10 = scmp.ge.s32.totalorder %s725_s28, 1 }
  0x30   : > { %s113_s30 = sld [smem:[%s1067_s22 + %s1069_s29]]  ;;  %p127_p4 = scmp.lt.s32.totalorder %s725_s28, 5 }
  0x31   : > { %s421_s6 = sshll.u32 %s721_s27, 1  ;;  %s112_s7 = scalar_lea.vmem [#allocation4], %s420_s18 }
  0x32   : > { %s122_s9 = sshll.u32 %s112_s7, 4  ;;  %p888_p7 = pnand %p423_p10, %p127_p4  ;;  %s892_s9 = int_to_ptr.vmem [resolvable:$true] %s122_s9 }
  0x33   : > { %s109_s22 = scalar_lea.sflag [#allocation5], %s108_s17  ;;  %p573_p12 = pneg %p881_p8 }
  0x36   : > { %s118_s11 = sadd.s32 %s421_s6, %s113_s30  ;;  %s576_s6 = scalar_lea.hbm %s1031_s1, 512 }
  0x37   : > { %s422_s12 = sshll.u32 %s118_s11, 7 }
  0x38   : > { %s897_s26 = scalar_lea.hbm %s1031_s1, %s422_s12 }
  0x39   : > { %s571_s18 = scalar_lea.hbm %s897_s26, 128  ;;  %p577_p2 = scmp.lt.u32.totalorder %s897_s26, %s1031_s1 }
  0x3a   : > { %p572_p11 = scmp.ne.s32.totalorder %s897_s26, %s571_s18  ;;  %p578_p3 = scmp.lt.u32.totalorder %s576_s6, %s571_s18 }
  0x3b   : > { %p580_p10 = scmp.lt.u32.totalorder %s571_s18, %s897_s26 }
  0x3c   : > { %p574_p13 = pnand %p573_p12, %p572_p11  ;;  %p579_p6 = por %p578_p3, %p577_p2 }
  0x3e   : > { %p575_p0 = pneg %p574_p13  ;;  %p581_p4 = por %p580_p10, %p579_p6 }
  0x40   : > { %p582_p5 = pnand %p581_p4, %p575_p0 }
  0x42   : > { %585 = shalt.err (!%p582_p5)
}
  0x43   : > { %s586_s17 = scalar_lea.vmem %s892_s9, 128  ;;  %s728_s7 = smov [#allocation4]  }
  0x44   : > { %p587_p11 = scmp.ne.s32.totalorder %s892_s9, %s586_s17  ;;  %s591_s11 = sshll.u32 %s728_s7, 4  ;;  %s592_s11 = int_to_ptr.vmem [resolvable:$false] %s591_s11 }
  0x45   : > { %s593_s12 = scalar_lea.vmem %s592_s11, 256  ;;  %p594_p9 = scmp.lt.s32.totalorder %s892_s9, %s592_s11 }
  0x46   : > { %p589_p13 = pnand %p587_p11, %p573_p12  ;;  %p595_p2 = scmp.lt.s32.totalorder %s593_s12, %s586_s17 }
  0x48   : > { %p590_p1 = pneg %p589_p13  ;;  %p596_p3 = por %p595_p2, %p594_p9 }
  0x4a   : > { %p597_p6 = pnand %p596_p3, %p590_p1 }
  0x4c   : > { %600 = shalt.err (!%p597_p6)
}
  0x4d   : > { %443 = dma.hbm_to_vmem [thread:$0]  (!%p881_p8), %s897_s26, 128, %s892_s9, %s109_s22  }
  0x4e   : > { %131 = sbr.rel (%p888_p7) target bundleno = 386 (0x182), region = 24  ;;  %s133_s18 = sand.u32 (!%p888_p7), 1, %s701_s23  }
  0x4f   : > { %s927_s29 = sshll.u32 (!%p888_p7), %s133_s18, 3  ;;  %s134_s30 = scalar_lea.sflag (!%p888_p7), [#allocation5], %s133_s18 }
  0x50   : > { %s137_s6 = scalar_lea.vmem (!%p888_p7), [#allocation4], %s927_s29  ;;  %p1046_p5 = scmp.ne.s32.totalorder (!%p888_p7), %s1041_s8, 0 }
  0x55   : > { %676 = dma.done.wait (%p1046_p5), %s134_s30, 128  }
  0x56   : > { %678 = vsyncadd (%p1046_p5), %s134_s30, 4294967168  ;;  %s153_s5 = sand.u32 1, %s689_s20   ;;  %p426_p9 = scmp.ne.s32.totalorder %s709_s0, 0 }
  0x57   : > { %s425_s26 = sshll.u32 %s153_s5, 3  ;;  %v161_v0 = vld [vmem:[%s137_s6] sm:$0xff] (!%p426_p9)  ;;  %s729_s10 = smov (!%p426_p9), 120   ;;  %vm166_vm0 = vcmask (!%p426_p9), 48128   ;;  %vm173_vm1 = vcmask (!%p426_p9), 64560   ;;  %vm180_vm2 = vcmask (!%p426_p9), 113728  }
  0x58   : > { %s937_s9 = scalar_lea.vmem [#allocation7], %s425_s26  ;;  %160 = sbr.rel (%p426_p9) target bundleno = 218 (0xda), region = 32  ;;  %163 = vrot.lane.b32.xlu0 (!%p426_p9), %v161_v0, %s729_s10  ;;  %vm187_vm3 = vcmask (!%p426_p9), 154736   ;;  %vm194_vm4 = vcmask (!%p426_p9), 195736   ;;  %vm201_vm5 = vcmask (!%p426_p9), 228544   ;;  %vm208_vm6 = vcmask (!%p426_p9), 244960  }
  0x59   : > { %s730_s22 = smov (!%p426_p9), 111   ;;  %s731_s8 = smov (!%p426_p9), 117   ;;  %vm215_vm7 = vcmask (!%p426_p9), 269552  }
  0x5a   : > { %177 = vrot.lane.b32.xlu1 (!%p426_p9), %v161_v0, %s730_s22  ;;  %s732_s3 = smov (!%p426_p9), 110   ;;  %s733_s4 = smov (!%p426_p9), 105  }
  0x5b   : > { %s734_s17 = smov (!%p426_p9), 103   ;;  %s735_s7 = smov (!%p426_p9), 96  }
  0x5c   : > { %170 = vrot.lane.b32.xlu0 (!%p426_p9), %v161_v0, %s731_s8  ;;  %s736_s11 = smov (!%p426_p9), 92  }
  0x5e   : > { %184 = vrot.lane.b32.xlu1 (!%p426_p9), %v161_v0, %s732_s3 }
  0x60   : > { %191 = vrot.lane.b32.xlu0 %v161_v0, %s733_s4 }
  0x62   : > { %198 = vrot.lane.b32.xlu1 %v161_v0, %s734_s17 }
  0x64   : > { %205 = vrot.lane.b32.xlu0 %v161_v0, %s735_s7 }
  0x66   : > { %212 = vrot.lane.b32.xlu1 %v161_v0, %s736_s11 }
  0xca   : > { %v164_v1 = vpop.permute.xlu0 %163 }
  0xcb   : > { %167 = vst.msk [vmem:[%s937_s9] sm:$0xff] %vm166_vm0, %v164_v1 }
  0xcc   : > { %v178_v2 = vpop.permute.xlu1 %177 }
  0xce   : > { %v171_v3 = vpop.permute.xlu0 %170 }
  0xcf   : > { %174 = vst.msk [vmem:[%s937_s9] sm:$0xff] %vm173_vm1, %v171_v3 }
  0xd0   : > { %v185_v4 = vpop.permute.xlu1 %184  ;;  %181 = vst.msk [vmem:[%s937_s9] sm:$0xff] %vm180_vm2, %v178_v2 }
  0xd1   : > { %188 = vst.msk [vmem:[%s937_s9] sm:$0xff] %vm187_vm3, %v185_v4 }
  0xd2   : > { %v192_v5 = vpop.permute.xlu0 %191 }
  0xd3   : > { %195 = vst.msk [vmem:[%s937_s9] sm:$0xff] %vm194_vm4, %v192_v5 }
  0xd4   : > { %v199_v6 = vpop.permute.xlu1 %198 }
  0xd5   : > { %202 = vst.msk [vmem:[%s937_s9] sm:$0xff] %vm201_vm5, %v199_v6 }
  0xd6   : > { %v206_v7 = vpop.permute.xlu0 %205 }
  0xd7   : > { %209 = vst.msk [vmem:[%s937_s9] sm:$0xff] %vm208_vm6, %v206_v7 }
  0xd8   : > { %v213_v8 = vpop.permute.xlu1 %212 }
  0xd9   : > { %216 = vst.msk [vmem:[%s937_s9] sm:$0xff] %vm215_vm7, %v213_v8 }
  0xda PF: > { %p427_p1 = scmp.ne.s32.totalorder %s709_s0, 1 }
  0xdb   : > { %v221_v9 = vld [vmem:[%s137_s6] sm:$0xff] (!%p427_p1)  ;;  %s737_s12 = smov (!%p427_p1), 127   ;;  %s738_s18 = smov (!%p427_p1), 116   ;;  %vm226_vm8 = vcmask (!%p427_p1), 277768   ;;  %vm233_vm9 = vcmask (!%p427_p1), 302352   ;;  %vm240_vm10 = vcmask (!%p427_p1), 359720  }
  0xdc   : > { %220 = sbr.rel (%p427_p1) target bundleno = 361 (0x169), region = 36  ;;  %223 = vrot.lane.b32.xlu0 (!%p427_p1), %v221_v9, %s737_s12  ;;  %237 = vrot.lane.b32.xlu1 (!%p427_p1), %v221_v9, %s738_s18  ;;  %s739_s30 = smov (!%p427_p1), 126   ;;  %vm247_vm11 = vcmask (!%p427_p1), 367968   ;;  %vm254_vm12 = vcmask (!%p427_p1), 384360   ;;  %vm261_vm13 = vcmask (!%p427_p1), 433528   ;;  %vm268_vm14 = vcmask (!%p427_p1), 458152  }
  0xdd   : > { %s740_s26 = smov (!%p427_p1), 113   ;;  %s741_s10 = smov (!%p427_p1), 111   ;;  %vm275_vm15 = vcmask (!%p427_p1), 474560   ;;  %vm282_vm0 = vcmask (!%p427_p1), 507344   ;;  %vm289_vm1 = vcmask (!%p427_p1), 531952   ;;  %vm296_vm2 = vcmask (!%p427_p1), 589320  }
  0xde   : > { %s742_s22 = smov (!%p427_p1), 110   ;;  %s743_s8 = smov (!%p427_p1), 107   ;;  %vm303_vm3 = vcmask (!%p427_p1), 613952   ;;  %vm310_vm4 = vcmask (!%p427_p1), 630360   ;;  %vm317_vm5 = vcmask (!%p427_p1), 654952  }
  0xdf   : > { %s744_s3 = smov (!%p427_p1), 106   ;;  %s745_s0 = smov (!%p427_p1), 105  }
  0xe0   : > { %230 = vrot.lane.b32.xlu0 (!%p427_p1), %v221_v9, %s739_s30  ;;  %244 = vrot.lane.b32.xlu1 (!%p427_p1), %v221_v9, %s740_s26  ;;  %s746_s29 = smov (!%p427_p1), 100   ;;  %s747_s6 = smov (!%p427_p1), 99  }
  0xe1   : > { %s748_s4 = smov (!%p427_p1), 93   ;;  %s749_s17 = smov (!%p427_p1), 91  }
  0xe2   : > { %s750_s7 = smov (!%p427_p1), 82  }
  0xe4   : > { %251 = vrot.lane.b32.xlu0 %v221_v9, %s741_s10  ;;  %258 = vrot.lane.b32.xlu1 %v221_v9, %s742_s22 }
  0xe8   : > { %265 = vrot.lane.b32.xlu0 %v221_v9, %s743_s8  ;;  %272 = vrot.lane.b32.xlu1 %v221_v9, %s744_s3 }
  0xec   : > { %279 = vrot.lane.b32.xlu0 %v221_v9, %s745_s0  ;;  %286 = vrot.lane.b32.xlu1 %v221_v9, %s746_s29 }
  0xf0   : > { %293 = vrot.lane.b32.xlu0 %v221_v9, %s747_s6  ;;  %300 = vrot.lane.b32.xlu1 %v221_v9, %s748_s4 }
  0xf4   : > { %307 = vrot.lane.b32.xlu0 %v221_v9, %s749_s17  ;;  %314 = vrot.lane.b32.xlu1 %v221_v9, %s750_s7 }
 0x14e   : > { %v224_v10 = vpop.permute.xlu0 %223  ;;  %v238_v11 = vpop.permute.xlu1 %237 }
 0x14f   : > { %227 = vst.msk [vmem:[%s937_s9] sm:$0xff] %vm226_vm8, %v224_v10 }
 0x152   : > { %v231_v12 = vpop.permute.xlu0 %230  ;;  %v245_v13 = vpop.permute.xlu1 %244 }
 0x153   : > { %234 = vst.msk [vmem:[%s937_s9] sm:$0xff] %vm233_vm9, %v231_v12 }
 0x154   : > { %241 = vst.msk [vmem:[%s937_s9] sm:$0xff] %vm240_vm10, %v238_v11 }
 0x155   : > { %248 = vst.msk [vmem:[%s937_s9] sm:$0xff] %vm247_vm11, %v245_v13 }
 0x156   : > { %v252_v14 = vpop.permute.xlu0 %251  ;;  %v259_v15 = vpop.permute.xlu1 %258 }
 0x157   : > { %255 = vst.msk [vmem:[%s937_s9] sm:$0xff] %vm254_vm12, %v252_v14 }
 0x158   : > { %262 = vst.msk [vmem:[%s937_s9] sm:$0xff] %vm261_vm13, %v259_v15 }
 0x15a   : > { %v266_v16 = vpop.permute.xlu0 %265  ;;  %v273_v17 = vpop.permute.xlu1 %272 }
 0x15b   : > { %269 = vst.msk [vmem:[%s937_s9] sm:$0xff] %vm268_vm14, %v266_v16 }
 0x15c   : > { %276 = vst.msk [vmem:[%s937_s9] sm:$0xff] %vm275_vm15, %v273_v17 }
 0x15e   : > { %v280_v18 = vpop.permute.xlu0 %279  ;;  %v287_v19 = vpop.permute.xlu1 %286 }
 0x15f   : > { %283 = vst.msk [vmem:[%s937_s9] sm:$0xff] %vm282_vm0, %v280_v18 }
 0x160   : > { %290 = vst.msk [vmem:[%s937_s9] sm:$0xff] %vm289_vm1, %v287_v19 }
 0x162   : > { %v294_v20 = vpop.permute.xlu0 %293  ;;  %v301_v21 = vpop.permute.xlu1 %300 }
 0x163   : > { %297 = vst.msk [vmem:[%s937_s9] sm:$0xff] %vm296_vm2, %v294_v20 }
 0x164   : > { %304 = vst.msk [vmem:[%s937_s9] sm:$0xff] %vm303_vm3, %v301_v21 }
 0x166   : > { %v308_v22 = vpop.permute.xlu0 %307  ;;  %v315_v23 = vpop.permute.xlu1 %314 }
 0x167   : > { %311 = vst.msk [vmem:[%s937_s9] sm:$0xff] %vm310_vm4, %v308_v22 }
 0x168   : > { %318 = vst.msk [vmem:[%s937_s9] sm:$0xff] %vm317_vm5, %v315_v23 }
 0x169 PF: > { %s429_s11 = sshll.u32 %s713_s25, 7  ;;  %s333_s26 = sshll.u32 %s937_s9, 4  ;;  %s334_s26 = int_to_ptr.vmem [resolvable:$true] %s333_s26 }
 0x16a   : > { %s971_s30 = scalar_lea.hbm %s1032_s2, %s429_s11  ;;  %s320_s10 = scalar_lea.sflag [#allocation6], %s153_s5 }
 0x16b   : > { %s601_s22 = scalar_lea.vmem %s334_s26, 128  ;;  %p1047_p7 = scmp.ne.s32.totalorder %s1042_s15, 0 }
 0x16c   : > { %p602_p8 = scmp.ne.s32.totalorder %s334_s26, %s601_s22  ;;  %s751_s8 = smov [#allocation7]  }
 0x16d   : > { %s605_s3 = sshll.u32 %s751_s8, 4  ;;  %s606_s3 = int_to_ptr.vmem [resolvable:$false] %s605_s3 }
 0x16e   : > { %p603_p12 = pnand %p602_p8, %p1047_p7  ;;  %s607_s0 = scalar_lea.vmem %s606_s3, 256 }
 0x16f   : > { %p608_p10 = scmp.lt.s32.totalorder %s334_s26, %s606_s3  ;;  %p609_p4 = scmp.lt.s32.totalorder %s607_s0, %s601_s22 }
 0x170   : > { %p604_p0 = pneg %p603_p12 }
 0x171   : > { %p610_p11 = por %p609_p4, %p608_p10 }
 0x173   : > { %p611_p13 = pnand %p610_p11, %p604_p0 }
 0x175   : > { %614 = shalt.err (!%p611_p13)
}
 0x176   : > { %s615_s25 = scalar_lea.hbm %s971_s30, 128  ;;  %s619_s29 = scalar_lea.hbm %s1032_s2, 256 }
 0x177   : > { %p616_p2 = scmp.ne.s32.totalorder %s971_s30, %s615_s25  ;;  %p620_p5 = scmp.lt.u32.totalorder %s971_s30, %s1032_s2 }
 0x178   : > { %p621_p9 = scmp.lt.u32.totalorder %s619_s29, %s615_s25  ;;  %p623_p8 = scmp.lt.u32.totalorder %s615_s25, %s971_s30 }
 0x179   : > { %p617_p3 = pnand %p616_p2, %p1047_p7 }
 0x17a   : > { %p622_p1 = por %p621_p9, %p620_p5 }
 0x17b   : > { %p618_p6 = pneg %p617_p3 }
 0x17c   : > { %p624_p12 = por %p623_p8, %p622_p1 }
 0x17e   : > { %p625_p0 = pnand %p624_p12, %p618_p6 }
 0x180   : > { %628 = shalt.err (!%p625_p0)
}
 0x181   : > { %436 = dma.vmem_to_hbm [thread:$0]  (%p1047_p7), %s334_s26, 128, %s971_s30, %s320_s10  }
 0x182 PF: > { %p449_p10 = scmp.ge.s32.totalorder %s725_s28, 2  ;;  %s345_s17 = sand.u32 1, %s685_s19  }
 0x183   : > { %p1048_p4 = scmp.ne.s32.totalorder %s1043_s16, 0  ;;  %s346_s7 = scalar_lea.sflag [#allocation6], %s345_s17 }
 0x185   : > { %p445_p11 = pnand %p449_p10, %p1048_p4 }
 0x187   : > { %680 = dma.done.wait (!%p445_p11), %s346_s7, 128  }
 0x188   : > { %682 = vsyncadd (!%p445_p11), %s346_s7, 4294967168  ;;  %s22_s28 = sadd.s32 1, %s725_s28   ;;  %s1049_s0 = sld [smem:[#allocation13_spill]] }
 0x189   : > { %p19_p13 = scmp.ge.s32.totalorder %s22_s28, 6   ;;  %s1050_s26 = sld [smem:[#allocation14_spill]] }
 0x18a   : > { %s1051_s15 = sld [smem:[#allocation15_spill]]  ;;  %s1052_s19 = smov %s689_s20 }
 0x18b   : > { %s1053_s20 = smov %s693_s21  ;;  %s1054_s21 = smov %s860_s13 }
 0x18c   : > { %s1055_s22 = smov %s701_s23  ;;  %s1056_s23 = smov %s705_s24 }
 0x18d   : > { %s1057_s24 = smov %s863_s14  ;;  %s1058_s25 = smov %s721_s27 }
 0x18e   :  { %21 = sbr.rel (!%p19_p13) target bundleno = 21 (0x15), region = 77 }
 0x190   : > { %s1059_s27 = smov %s1051_s15 }
 0x195   :  { %351 = vsyncpa [#allocation5], 1 }
 0x196   :  { %353 = vsyncpa [#allocation5 + $0x1], 1 }
 0x197   :  { %354 = vsyncpa [#allocation6], 1 }
 0x198   :  { %356 = vsyncpa [#allocation6 + $0x1], 1 }

</bundles_post_ra>
